<compile_context>
chip_gen: v6e
topology: v6e:2x2x1
jax: 0.10.0
libtpu: 0.0.40
codegen_flags: <defaults>
</compile_context>

<pallas_src>
import jax
import jax.numpy as jnp
from jax import lax
from jax.experimental import pallas as pl
from jax.experimental.pallas import tpu as pltpu

HIDDEN = 50       # hidden width, as in the PyTorch module
TB_MAX = 8192     # max batch-tile (rows per grid step)


def _round_up(x, m):
    return ((x + m - 1) // m) * m


def _choose_tiling(B):
    """Pick (tile_rows, num_tiles) with no input padding.

    Small batches: a single block equal to the full batch (no overhang at all).
    Large batches: multiple-of-128 tiles, overhang on the last tile < 128 rows
    per tile (handled by Pallas edge-block masking); >= 2 tiles so both v7x
    TensorCores are used.
    """
    if B <= 1024:
        return B, 1
    num_tiles = max(pl.cdiv(B, TB_MAX), 2)
    tb = _round_up(pl.cdiv(B, num_tiles), 128)
    num_tiles = pl.cdiv(B, tb)
    return tb, num_tiles


def value_net_kernel(x_ref,
                     w1_ref, b1_ref,
                     w2_ref, b2_ref,
                     w3_ref, b3_ref,
                     w4t_ref, b4_ref,
                     o_ref):
    # x_ref: (TB, D) f32 in native batch-major layout.
    # w1..w3: bf16, PyTorch (out, in) layout.  b*: f32 (out, 1).  w4t: f32 (HIDDEN, 1).
    # o_ref: (1, TB) f32 (lane-dense output).
    x = x_ref[...].astype(jnp.bfloat16)

    # Layer 1: contract over D of both operands -> (HIDDEN, TB); batch lands on lanes.
    h = lax.dot_general(w1_ref[...], x, (((1,), (1,)), ((), ())),
                        preferred_element_type=jnp.float32)
    h = jnp.tanh(h + b1_ref[...])

    # Layers 2 & 3: bf16 MXU matmuls, f32 accumulation / bias / tanh.
    h = jnp.dot(w2_ref[...], h.astype(jnp.bfloat16), preferred_element_type=jnp.float32)
    h = jnp.tanh(h + b2_ref[...])
    h = jnp.dot(w3_ref[...], h.astype(jnp.bfloat16), preferred_element_type=jnp.float32)
    h = jnp.tanh(h + b3_ref[...])

    # Layer 4 ((1,50)@(50,TB)) on the VPU/XLU: broadcast multiply + sublane reduce,
    # keeping it off the MXU (which is the critical unit for this kernel).
    y = jnp.sum(w4t_ref[...] * h, axis=0, keepdims=True) + b4_ref[...]
    o_ref[...] = y.astype(o_ref.dtype)


def value_network_forward(states, params):
    """states: (B, state_dim) float32; params: w1..w4 in (out, in) layout, b1..b4 as (out, 1).

    Returns (B, 1) float32, matching PyTorch Sequential(Linear, Tanh, ..., Linear)."""
    B, D = states.shape
    tb, num_tiles = _choose_tiling(B)

    # Cast the (VMEM-resident) weights to bf16 once; biases stay f32.
    w1 = params["w1"].astype(jnp.bfloat16)
    w2 = params["w2"].astype(jnp.bfloat16)
    w3 = params["w3"].astype(jnp.bfloat16)
    w4t = params["w4"].T  # (HIDDEN, 1) f32, consumed by the VPU MAC in the kernel.
    b1, b2, b3, b4 = params["b1"], params["b2"], params["b3"], params["b4"]

    def resident(shape):
        # Constant index_map => block stays resident in VMEM across grid steps.
        return pl.BlockSpec(shape, lambda i: (0, 0))

    in_specs = [
        pl.BlockSpec((tb, D), lambda i: (i, 0)),          # x tile (pipelined, native layout)
        resident((HIDDEN, D)),      resident((HIDDEN, 1)),
        resident((HIDDEN, HIDDEN)), resident((HIDDEN, 1)),
        resident((HIDDEN, HIDDEN)), resident((HIDDEN, 1)),
        resident((HIDDEN, 1)),      resident((1, 1)),
    ]
    out_spec = pl.BlockSpec((1, tb), lambda i: (0, i))     # lane-dense output row

    param_bytes = sum(int(p.size) * 4 for p in params.values())
    cost = pl.CostEstimate(
        flops=2 * B * (D * HIDDEN + 2 * HIDDEN * HIDDEN + HIDDEN),
        transcendentals=3 * B * HIDDEN,
        bytes_accessed=B * (D + 1) * 4 + param_bytes,
    )

    out_row = pl.pallas_call(
        value_net_kernel,
        out_shape=jax.ShapeDtypeStruct((1, B), jnp.float32),
        grid=(num_tiles,),
        in_specs=in_specs,
        out_specs=out_spec,
        compiler_params=pltpu.CompilerParams(
            dimension_semantics=("parallel",),
            vmem_limit_bytes=48 * 1024 * 1024,
        ),
        cost_estimate=cost,
    )(states.astype(jnp.float32), w1, b1, w2, b2, w3, b3, w4t, b4)

    return out_row[0].reshape(B, 1)


def init_params(key, state_dim):
    """Deterministic init mimicking PyTorch Linear default (uniform +/- 1/sqrt(fan_in)).

    Weights stored in PyTorch (out_features, in_features) layout; biases as (out_features, 1)."""
    dims = [(state_dim, HIDDEN), (HIDDEN, HIDDEN), (HIDDEN, HIDDEN), (HIDDEN, 1)]
    params = {}
    for i, (fan_in, fan_out) in enumerate(dims, start=1):
        key, kw, kb = jax.random.split(key, 3)
        bound = 1.0 / float(fan_in) ** 0.5
        params[f"w{i}"] = jax.random.uniform(kw, (fan_out, fan_in), jnp.float32,
                                             minval=-bound, maxval=bound)
        params[f"b{i}"] = jax.random.uniform(kb, (fan_out, 1), jnp.float32,
                                             minval=-bound, maxval=bound)
    return params


def reference_forward(states, params):
    h = jnp.tanh(states @ params["w1"].T + params["b1"].T)
    h = jnp.tanh(h @ params["w2"].T + params["b2"].T)
    h = jnp.tanh(h @ params["w3"].T + params["b3"].T)
    return h @ params["w4"].T + params["b4"].T


if __name__ == "__main__":
    key = jax.random.PRNGKey(0)
    key, k_states = jax.random.split(key)

    B, state_dim = 8, 16
    states = jax.random.normal(k_states, (B, state_dim), jnp.float32)
    params = init_params(key, state_dim)

    out = jax.block_until_ready(value_network_forward(states, params))
    ref = reference_forward(states, params)
    assert out.shape == (B, 1), out.shape
    # bf16 matmuls -> loosened tolerance vs the pure-f32 reference.
    assert jnp.allclose(out, ref, atol=4e-2, rtol=4e-2), "mismatch vs pure-JAX reference"

    # Exercise a non-aligned batch as well.
    B2 = 300
    key, k2 = jax.random.split(key)
    states2 = jax.random.normal(k2, (B2, state_dim), jnp.float32)
    out2 = jax.block_until_ready(value_network_forward(states2, params))
    ref2 = reference_forward(states2, params)
    assert out2.shape == (B2, 1), out2.shape
    assert jnp.allclose(out2, ref2, atol=4e-2, rtol=4e-2), "mismatch on non-aligned batch"

    print("KERNEL_OK")
</pallas_src>

<mosaic_0001>
module attributes {stable_mosaic.version = 11 : i64} {
  func.func @value_net_kernel(%arg0: i32, %arg1: memref<8x16xf32, #tpu.memory_space<vmem>>, %arg2: memref<50x16xbf16, #tpu.memory_space<vmem>>, %arg3: memref<50x1xf32, #tpu.memory_space<vmem>>, %arg4: memref<50x50xbf16, #tpu.memory_space<vmem>>, %arg5: memref<50x1xf32, #tpu.memory_space<vmem>>, %arg6: memref<50x50xbf16, #tpu.memory_space<vmem>>, %arg7: memref<50x1xf32, #tpu.memory_space<vmem>>, %arg8: memref<50x1xf32, #tpu.memory_space<vmem>>, %arg9: memref<1x1xf32, #tpu.memory_space<vmem>>, %arg10: memref<1x8xf32, #tpu.memory_space<vmem>>) attributes {dimension_semantics = [#tpu.dimension_semantics<parallel>], iteration_bounds = array<i64: 1>, scalar_prefetch = 0 : i64, scratch_operands = 0 : i64, tpu.core_type = #tpu.core_type<tc>, window_params = [{transform_indices = @transform_0, window_bounds = array<i64: 8, 16>}, {pipeline_mode = #tpu.pipeline_mode<synchronous>, transform_indices = @transform_1, window_bounds = array<i64: 50, 16>}, {pipeline_mode = #tpu.pipeline_mode<synchronous>, transform_indices = @transform_2, window_bounds = array<i64: 50, 1>}, {pipeline_mode = #tpu.pipeline_mode<synchronous>, transform_indices = @transform_3, window_bounds = array<i64: 50, 50>}, {pipeline_mode = #tpu.pipeline_mode<synchronous>, transform_indices = @transform_4, window_bounds = array<i64: 50, 1>}, {pipeline_mode = #tpu.pipeline_mode<synchronous>, transform_indices = @transform_5, window_bounds = array<i64: 50, 50>}, {pipeline_mode = #tpu.pipeline_mode<synchronous>, transform_indices = @transform_6, window_bounds = array<i64: 50, 1>}, {pipeline_mode = #tpu.pipeline_mode<synchronous>, transform_indices = @transform_7, window_bounds = array<i64: 50, 1>}, {pipeline_mode = #tpu.pipeline_mode<synchronous>, transform_indices = @transform_8, window_bounds = array<i64: 1, 1>}, {transform_indices = @transform_9, window_bounds = array<i64: 1, 8>}]} {
    %c0 = arith.constant 0 : index
    %c0_0 = arith.constant 0 : index
    %0 = vector.load %arg1[%c0, %c0_0] : memref<8x16xf32, #tpu.memory_space<vmem>>, vector<8x16xf32>
    %1 = arith.truncf %0 : vector<8x16xf32> to vector<8x16xbf16>
    %c0_1 = arith.constant 0 : index
    %c0_2 = arith.constant 0 : index
    %2 = vector.load %arg2[%c0_1, %c0_2] : memref<50x16xbf16, #tpu.memory_space<vmem>>, vector<50x16xbf16>
    %cst = arith.constant dense<0.000000e+00> : vector<50x8xf32>
    %3 = tpu.matmul %2, %1, %cst {dimension_numbers = #tpu.dot_dimension_numbers<[1], [1], [0], [0], [0, 0, 1, 0], [], []>} : vector<50x16xbf16>, vector<8x16xbf16>, vector<50x8xf32> -> vector<50x8xf32>
    %c0_3 = arith.constant 0 : index
    %c0_4 = arith.constant 0 : index
    %4 = vector.load %arg3[%c0_3, %c0_4] : memref<50x1xf32, #tpu.memory_space<vmem>>, vector<50x1xf32>
    %5 = vector.broadcast %4 : vector<50x1xf32> to vector<50x8xf32>
    %6 = arith.addf %3, %5 : vector<50x8xf32>
    %7 = math.tanh %6 : vector<50x8xf32>
    %c0_5 = arith.constant 0 : index
    %c0_6 = arith.constant 0 : index
    %8 = vector.load %arg4[%c0_5, %c0_6] : memref<50x50xbf16, #tpu.memory_space<vmem>>, vector<50x50xbf16>
    %9 = arith.truncf %7 : vector<50x8xf32> to vector<50x8xbf16>
    %cst_7 = arith.constant dense<0.000000e+00> : vector<50x8xf32>
    %10 = tpu.matmul %8, %9, %cst_7 {dimension_numbers = #tpu.dot_dimension_numbers<[1], [0], [0], [1], [0, 0, 1, 1], [], []>} : vector<50x50xbf16>, vector<50x8xbf16>, vector<50x8xf32> -> vector<50x8xf32>
    %c0_8 = arith.constant 0 : index
    %c0_9 = arith.constant 0 : index
    %11 = vector.load %arg5[%c0_8, %c0_9] : memref<50x1xf32, #tpu.memory_space<vmem>>, vector<50x1xf32>
    %12 = vector.broadcast %11 : vector<50x1xf32> to vector<50x8xf32>
    %13 = arith.addf %10, %12 : vector<50x8xf32>
    %14 = math.tanh %13 : vector<50x8xf32>
    %c0_10 = arith.constant 0 : index
    %c0_11 = arith.constant 0 : index
    %15 = vector.load %arg6[%c0_10, %c0_11] : memref<50x50xbf16, #tpu.memory_space<vmem>>, vector<50x50xbf16>
    %16 = arith.truncf %14 : vector<50x8xf32> to vector<50x8xbf16>
    %cst_12 = arith.constant dense<0.000000e+00> : vector<50x8xf32>
    %17 = tpu.matmul %15, %16, %cst_12 {dimension_numbers = #tpu.dot_dimension_numbers<[1], [0], [0], [1], [0, 0, 1, 1], [], []>} : vector<50x50xbf16>, vector<50x8xbf16>, vector<50x8xf32> -> vector<50x8xf32>
    %c0_13 = arith.constant 0 : index
    %c0_14 = arith.constant 0 : index
    %18 = vector.load %arg7[%c0_13, %c0_14] : memref<50x1xf32, #tpu.memory_space<vmem>>, vector<50x1xf32>
    %19 = vector.broadcast %18 : vector<50x1xf32> to vector<50x8xf32>
    %20 = arith.addf %17, %19 : vector<50x8xf32>
    %21 = math.tanh %20 : vector<50x8xf32>
    %c0_15 = arith.constant 0 : index
    %c0_16 = arith.constant 0 : index
    %22 = vector.load %arg8[%c0_15, %c0_16] : memref<50x1xf32, #tpu.memory_space<vmem>>, vector<50x1xf32>
    %23 = vector.broadcast %22 : vector<50x1xf32> to vector<50x8xf32>
    %24 = arith.mulf %23, %21 : vector<50x8xf32>
    %cst_17 = arith.constant dense<0.000000e+00> : vector<8xf32>
    %25 = vector.multi_reduction <add>, %24, %cst_17 [0] : vector<50x8xf32> to vector<8xf32>
    %26 = vector.shape_cast %25 : vector<8xf32> to vector<1x8xf32>
    %c0_18 = arith.constant 0 : index
    %c0_19 = arith.constant 0 : index
    %27 = vector.load %arg9[%c0_18, %c0_19] : memref<1x1xf32, #tpu.memory_space<vmem>>, vector<1x1xf32>
    %28 = vector.broadcast %27 : vector<1x1xf32> to vector<1x8xf32>
    %29 = arith.addf %26, %28 : vector<1x8xf32>
    %c0_20 = arith.constant 0 : index
    %c0_21 = arith.constant 0 : index
    %30 = vector.load %arg10[%c0_20, %c0_21] : memref<1x8xf32, #tpu.memory_space<vmem>>, vector<1x8xf32>
    tpu.vector_store %arg10[%c0_20, %c0_21], %29 {strides = array<i32>} : memref<1x8xf32, #tpu.memory_space<vmem>>, vector<1x8xf32>,
    return
  }
  func.func @transform_0(%arg0: i32) -> (i32, i32) {
    %c0_i32 = arith.constant 0 : i32
    %c0_i32_0 = arith.constant 0 : i32
    return %arg0, %c0_i32 : i32, i32
  }
  func.func @transform_1(%arg0: i32) -> (i32, i32) {
    %c0_i32 = arith.constant 0 : i32
    %c0_i32_0 = arith.constant 0 : i32
    %c0_i32_1 = arith.constant 0 : i32
    return %c0_i32, %c0_i32_0 : i32, i32
  }
  func.func @transform_2(%arg0: i32) -> (i32, i32) {
    %c0_i32 = arith.constant 0 : i32
    %c0_i32_0 = arith.constant 0 : i32
    %c0_i32_1 = arith.constant 0 : i32
    return %c0_i32, %c0_i32_0 : i32, i32
  }
  func.func @transform_3(%arg0: i32) -> (i32, i32) {
    %c0_i32 = arith.constant 0 : i32
    %c0_i32_0 = arith.constant 0 : i32
    %c0_i32_1 = arith.constant 0 : i32
    return %c0_i32, %c0_i32_0 : i32, i32
  }
  func.func @transform_4(%arg0: i32) -> (i32, i32) {
    %c0_i32 = arith.constant 0 : i32
    %c0_i32_0 = arith.constant 0 : i32
    %c0_i32_1 = arith.constant 0 : i32
    return %c0_i32, %c0_i32_0 : i32, i32
  }
  func.func @transform_5(%arg0: i32) -> (i32, i32) {
    %c0_i32 = arith.constant 0 : i32
    %c0_i32_0 = arith.constant 0 : i32
    %c0_i32_1 = arith.constant 0 : i32
    return %c0_i32, %c0_i32_0 : i32, i32
  }
  func.func @transform_6(%arg0: i32) -> (i32, i32) {
    %c0_i32 = arith.constant 0 : i32
    %c0_i32_0 = arith.constant 0 : i32
    %c0_i32_1 = arith.constant 0 : i32
    return %c0_i32, %c0_i32_0 : i32, i32
  }
  func.func @transform_7(%arg0: i32) -> (i32, i32) {
    %c0_i32 = arith.constant 0 : i32
    %c0_i32_0 = arith.constant 0 : i32
    %c0_i32_1 = arith.constant 0 : i32
    return %c0_i32, %c0_i32_0 : i32, i32
  }
  func.func @transform_8(%arg0: i32) -> (i32, i32) {
    %c0_i32 = arith.constant 0 : i32
    %c0_i32_0 = arith.constant 0 : i32
    %c0_i32_1 = arith.constant 0 : i32
    return %c0_i32, %c0_i32_0 : i32, i32
  }
  func.func @transform_9(%arg0: i32) -> (i32, i32) {
    %c0_i32 = arith.constant 0 : i32
    %c0_i32_0 = arith.constant 0 : i32
    return %c0_i32, %arg0 : i32, i32
  }
}

</mosaic_0001>

<bundles_post_ra>
// kernel: tpu_custom_call.1
= control target key start
LH: loop header
LB: loop body
LE: loop exit
PB: predicated region body
PF: predicated region fallthrough
CT: control target
= control target key end

     0   :  { %s980_s0 = inlined_call_operand.vmem [shape: f32[8,16], index: 0, kind: input, shape index: {}]   ;;  %s981_s1 = inlined_call_operand.vmem [shape: bf16[50,16], index: 1, kind: input, shape index: {}]   ;;  %s982_s2 = inlined_call_operand.vmem [shape: f32[50,1], index: 2, kind: input, shape index: {}]   ;;  %s983_s3 = inlined_call_operand.vmem [shape: bf16[50,50], index: 3, kind: input, shape index: {}]   ;;  %s984_s4 = inlined_call_operand.vmem [shape: f32[50,1], index: 4, kind: input, shape index: {}]   ;;  %s985_s5 = inlined_call_operand.vmem [shape: bf16[50,50], index: 5, kind: input, shape index: {}]   ;;  %s986_s6 = inlined_call_operand.vmem [shape: f32[50,1], index: 6, kind: input, shape index: {}]   ;;  %s987_s7 = inlined_call_operand.vmem [shape: f32[50,1], index: 7, kind: input, shape index: {}]   ;;  %s988_s8 = inlined_call_operand.<no memory space> [shape: f32[1,1], index: 8, kind: input, shape index: {}]   ;;  %s989_s9 = inlined_call_operand.hbm [shape: f32[1,8], index: 9, kind: output, shape index: {}]  }
   0x1   :  { %v14_v0 = vstv %s988_s8 }
   0x2   :  { %15 = vst [vmem:[#allocation2] sm:$0x1] %v14_v0 }
   0x3   :  { %v36_v1 = vld [vmem:[%s980_s0] sm:$0xff]  ;;  %vm105_vm0 = vcmask 130048   ;;  %v775_v4 = vmov 0   ;;  %v51_v6 = vld [vmem:[%s982_s2 + $0x30] sm:$0x3]  ;;  %v50_v7 = vld [vmem:[%s982_s2 + $0x28] sm:$0xff] }
   0x4   :  { %v37_v2 = vpack.c.bf16 %v36_v1, %v36_v1  ;;  %v699_v3 = vld [vmem:[%s981_s1] sm:$0xff]   ;;  %697 = vset.pattern.permute.xlu0 %v775_v4  ;;  %698 = vset.pattern.permute.xlu1 %v775_v4  ;;  %v47_v9 = vld [vmem:[%s982_s2 + $0x10] sm:$0xff]  ;;  %v700_v10 = vld [vmem:[%s981_s1 + $0x8] sm:$0xff]  }
   0x5   :  { %652 = vmatprep.mubr.msk.bf16.mxu0 %vm105_vm0, %v699_v3  ;;  %84 = vperm.xlu0 %697, %v51_v6   ;;  %v49_v8 = vld [vmem:[%s982_s2 + $0x20] sm:$0xff]  ;;  %v701_v11 = vld [vmem:[%s981_s1 + $0x10] sm:$0xff]   ;;  %v48_v12 = vld [vmem:[%s982_s2 + $0x18] sm:$0xff] }
   0x6   :  { %692 = vmatprep.subr.msk.bf16.mxu0 %vm105_vm0, %v37_v2  ;;  %v119_v5 = vsel %vm105_vm0, %v37_v2, 0  ;;  %79 = vperm.xlu1 %698, %v50_v7   ;;  %v45_v13 = vld [vmem:[%s982_s2] sm:$0xff]  ;;  %v702_v14 = vld [vmem:[%s981_s1 + $0x18] ss:$0 sps:$4 sm:$0x11]   ;;  %v46_v15 = vld [vmem:[%s982_s2 + $0x8] sm:$0xff] }
   0x7   :  { %651 = vmatpush3.bf16.xpose.msra.mxu0 %v119_v5  ;;  %v209_v16 = vld [vmem:[%s984_s4 + $0x30] sm:$0x3]  ;;  %v207_v17 = vld [vmem:[%s984_s4 + $0x20] sm:$0xff]  ;;  %v208_v18 = vld [vmem:[%s984_s4 + $0x28] sm:$0xff] }
   0x9   :  { %74 = vperm.xlu0 %697, %v49_v8  }
   0xa   :  { %64 = vperm.xlu1 %698, %v47_v9  }
   0xd   :  { %69 = vperm.xlu0 %697, %v48_v12  }
   0xe   :  { %653 = vmatmul.mubr.msk.bf16.vlgmr.msra.gmra.mxu0 %vm105_vm0, %v700_v10  ;;  %54 = vperm.xlu1 %698, %v45_v13  }
   0xf   :  { %656 = vmatprep.mubr.msk.bf16.mxu0 %vm105_vm0, %v701_v11 }
  0x11   :  { %59 = vperm.xlu0 %697, %v46_v15  }
  0x12   :  { %242 = vperm.xlu1 %698, %v209_v16  }
  0x13   :  { %16 = vsyncpa [#allocation4], 0  ;;  %v205_v19 = vld [vmem:[%s984_s4 + $0x10] sm:$0xff]  ;;  %v206_v20 = vld [vmem:[%s984_s4 + $0x18] sm:$0xff]  ;;  %vm263_vm1 = vcmask 408576   ;;  %vm276_vm2 = vcmask 1040384  }
  0x14   :  { %v203_v21 = vld [vmem:[%s984_s4] sm:$0xff]  ;;  %v204_v22 = vld [vmem:[%s984_s4 + $0x8] sm:$0xff]  ;;  %v364_v25 = vld [vmem:[%s986_s6 + $0x10] sm:$0xff]  ;;  %vm557_vm3 = vcmask 64512   ;;  %vm569_vm4 = vcmask 58368   ;;  %vm589_vm5 = vcmask 57344  }
  0x15   :  { %232 = vperm.xlu0 %697, %v207_v17   ;;  %v362_v23 = vld [vmem:[%s986_s6] sm:$0xff]  ;;  %v363_v24 = vld [vmem:[%s986_s6 + $0x8] sm:$0xff]  ;;  %v365_v26 = vld [vmem:[%s986_s6 + $0x18] sm:$0xff] }
  0x16   :  { %657 = vmatmul.mubr.msk.bf16.gmra.mxu0 %vm105_vm0, %v702_v14  ;;  %237 = vperm.xlu1 %698, %v208_v18   ;;  %v366_v27 = vld [vmem:[%s986_s6 + $0x20] sm:$0xff]  ;;  %v367_v28 = vld [vmem:[%s986_s6 + $0x28] sm:$0xff]  ;;  %v368_v29 = vld [vmem:[%s986_s6 + $0x30] sm:$0x3] }
  0x17   :  { %v508_v30 = vld [vmem:[%s987_s7] sm:$0xff]  ;;  %v509_v31 = vld [vmem:[%s987_s7 + $0x8] sm:$0xff]  ;;  %v510_v32 = vld [vmem:[%s987_s7 + $0x10] sm:$0xff] }
  0x18   :  { %v511_v33 = vld [vmem:[%s987_s7 + $0x18] sm:$0xff]  ;;  %v512_v34 = vld [vmem:[%s987_s7 + $0x20] sm:$0xff]  ;;  %v513_v35 = vld [vmem:[%s987_s7 + $0x28] sm:$0xff] }
  0x19   :  { %222 = vperm.xlu0 %697, %v205_v19   ;;  %v514_v36 = vld [vmem:[%s987_s7 + $0x30] sm:$0x3]  ;;  %v578_v37 = vld [vmem:[#allocation2] sm:$0x1]  ;;  %v704_v9 = vld [vmem:[%s983_s3 + $0x8] sm:$0xff]  }
  0x1a   :  { %227 = vperm.xlu1 %698, %v206_v20   ;;  %v703_v38 = vld [vmem:[%s983_s3] sm:$0xff]   ;;  %v705_v10 = vld [vmem:[%s983_s3 + $0x10] sm:$0xff]   ;;  %v706_v11 = vld [vmem:[%s983_s3 + $0x18] ss:$0 sps:$4 sm:$0x11]  }
  0x1b   :  { %668 = vmatprep.mubr.msk.bf16.mxu1 %vm263_vm1, %v703_v38  ;;  %v707_v12 = vld [vmem:[%s985_s5] sm:$0xff]  }
  0x1c   :  { %684 = vmatprep.mubr.msk.bf16.mxu0 %vm263_vm1, %v707_v12 }
  0x1d   :  { %212 = vperm.xlu0 %697, %v203_v21  }
  0x1e   :  { %217 = vperm.xlu1 %698, %v204_v22  }
  0x21   :  { %371 = vperm.xlu0 %697, %v362_v23  }
  0x22   :  { %376 = vperm.xlu1 %698, %v363_v24  }
  0x25   :  { %381 = vperm.xlu0 %697, %v364_v25  }
  0x26   :  { %386 = vperm.xlu1 %698, %v365_v26  }
  0x29   :  { %391 = vperm.xlu0 %697, %v366_v27  }
  0x2a   :  { %396 = vperm.xlu1 %698, %v367_v28  }
  0x2d   :  { %401 = vperm.xlu0 %697, %v368_v29  }
  0x2e   :  { %517 = vperm.xlu1 %698, %v508_v30  }
  0x31   :  { %522 = vperm.xlu0 %697, %v509_v31  }
  0x32   :  { %527 = vperm.xlu1 %698, %v510_v32  }
  0x35   :  { %532 = vperm.xlu0 %697, %v511_v33  }
  0x36   :  { %537 = vperm.xlu1 %698, %v512_v34  }
  0x39   :  { %542 = vperm.xlu0 %697, %v513_v35  }
  0x3a   :  { %547 = vperm.xlu1 %698, %v514_v36  }
  0x3d   :  { %581 = vperm.xlu0 %697, %v578_v37  }
  0x80   :  { %v85_v39 = vpop.permute.xlu0 %84 }
  0x81   :  { %v80_v44 = vpop.permute.xlu1 %79 }
  0x84   :  { %v75_v42 = vpop.permute.xlu0 %74 }
  0x85   :  { %v65_v51 = vpop.permute.xlu1 %64 }
  0x88   :  { %v70_v48 = vpop.permute.xlu0 %69 }
  0x89   :  { %v55_v59 = vpop.permute.xlu1 %54 }
  0x8c   :  { %v60_v57 = vpop.permute.xlu0 %59 }
  0x8d   :  { %v243_v13 = vpop.permute.xlu1 %242 }
  0x90   :  { %v233_v18 = vpop.permute.xlu0 %232 }
  0x91   :  { %v238_v16 = vpop.permute.xlu1 %237 }
  0x94   :  { %v223_v25 = vpop.permute.xlu0 %222 }
  0x95   :  { %v228_v22 = vpop.permute.xlu1 %227 }
  0x98   :  { %v213_v33 = vpop.permute.xlu0 %212 }
  0x99   :  { %v218_v31 = vpop.permute.xlu1 %217 }
  0xce   :  { %v654_v40 = vpop.f32.mrf.mxu0 }
  0xcf   :  { %v164_v55 = vadd.f32 %v654_v40, %v65_v51  ;;  %v377_v51 = vpop.permute.xlu1 %376 }
  0xd0   :  { %v155_v41 = vpop.f32.mrf.mxu0 }
  0xd1   :  { %v156_v60 = vadd.f32 %v155_v41, %v55_v59 }
  0xd2   :  { %v655_v43 = vpop.f32.mrf.mxu0 }
  0xd3   :  { %v167_v50 = vadd.f32 %v655_v43, %v70_v48  ;;  %v709_v48 = vld [vmem:[%s985_s5 + $0x10] sm:$0xff]  }
  0xd4   :  { %v158_v45 = vpop.f32.mrf.mxu0 }
  0xd5   :  { %v159_v58 = vadd.f32 %v158_v45, %v60_v57 }
  0xd6   :  { %v658_v46 = vpop.f32.mrf.mxu0 }
  0xd7   :  { %v180_v47 = vadd.f32 %v658_v46, %v85_v39 }
  0xd8   :  { %v171_v49 = vpop.f32.mrf.mxu0 }
  0xd9   :  { %711 = vtanh.f32 %v180_v47  ;;  %v172_v52 = vadd.f32 %v171_v49, %v75_v42  ;;  %v708_v47 = vld [vmem:[%s985_s5 + $0x8] sm:$0xff]   ;;  %v710_v49 = vld [vmem:[%s985_s5 + $0x18] ss:$0 sps:$4 sm:$0x11]   ;;  %s776_s5 = smov [#allocation3]  }
  0xda   :  { %v659_v53 = vpop.f32.mrf.mxu0  ;;  %713 = vtanh.f32 %v167_v50  ;;  %v372_v50 = vpop.permute.xlu0 %371  ;;  %s597_s8 = sshll.u32 %s776_s5, 4  ;;  %s598_s8 = int_to_ptr.vmem [resolvable:$true] %s597_s8 }
  0xdb   :  { %715 = vtanh.f32 %v172_v52  ;;  %v387_v53 = vpop.permute.xlu1 %386  ;;  %s753_s15 = scalar_lea.vmem %s598_s8, 16  ;;  %s757_s0 = scalar_lea.vmem %s598_s8, 32 }
  0xdc   :  { %v174_v54 = vpop.f32.mrf.mxu0  ;;  %p754_p0 = scmp.ne.s32.totalorder %s598_s8, %s753_s15  ;;  %p758_p1 = scmp.lt.s32.totalorder %s598_s8, %s598_s8 }
  0xdd   :  { %v175_v56 = vadd.f32 %v174_v54, %v80_v44  ;;  %p759_p2 = scmp.lt.s32.totalorder %s757_s0, %s753_s15 }
  0xde   :  { %v382_v52 = vpop.permute.xlu0 %381 }
  0xdf   :  { %717 = vtanh.f32 %v175_v56  ;;  %p760_p3 = por %p759_p2, %p758_p1 }
  0xe0   :  { %719 = vtanh.f32 %v164_v55 }
  0xe1   :  { %721 = vtanh.f32 %v159_v58  ;;  %p761_p4 = pnand %p760_p3, %p754_p0 }
  0xe2   :  { %723 = vtanh.f32 %v156_v60  ;;  %v392_v58 = vpop.permute.xlu0 %391 }
  0xe6   :  { %v712_v61 = vpop.eup %711 }
  0xe7   :  { %v202_v62 = vpack.c.bf16 %v712_v61, %v712_v61  ;;  %v714_v0 = vpop.eup %713  ;;  %v397_v61 = vpop.permute.xlu1 %396 }
  0xe8   :  { %v716_v1 = vpop.eup %715 }
  0xe9   :  { %693 = vmatprep.subr.msk.bf16.mxu1 %vm276_vm2, %v202_v62  ;;  %v278_v63 = vsel %vm276_vm2, %v202_v62, 0 }
  0xea   :  { %661 = vmatpush3.bf16.msra.mxu1 %v278_v63 }
  0xec   :  { %v718_v2 = vpop.eup %717 }
  0xed   :  { %v201_v3 = vpack.c.bf16 %v718_v2, %v716_v1  ;;  %v720_v4 = vpop.eup %719  ;;  %v402_v1 = vpop.permute.xlu0 %401 }
  0xee   :  { %v200_v5 = vpack.c.bf16 %v714_v0, %v720_v4  ;;  %v722_v6 = vpop.eup %721 }
  0xef   :  { %662 = vmatprep.subr.bf16.mxu1 %v201_v3  ;;  %v724_v7 = vpop.eup %723 }
  0xf0   :  { %663 = vmatpush3.bf16.msra.mxu1 %v201_v3  ;;  %v199_v8 = vpack.c.bf16 %v722_v6, %v724_v7 }
  0xf1   :  { %664 = vmatprep.subr.bf16.mxu1 %v200_v5 }
  0xf4   :  { %665 = vmatpush3.bf16.msra.mxu1 %v200_v5  ;;  %v518_v5 = vpop.permute.xlu1 %517 }
  0xf5   :  { %666 = vmatprep.subr.bf16.mxu1 %v199_v8 }
  0xf8   :  { %667 = vmatpush3.bf16.msra.mxu1 %v199_v8 }
  0xfb   :  { %669 = vmatmul.mubr.msk.bf16.vlgmr.msra.gmra.mxu1 %vm263_vm1, %v704_v9 }
  0xfc   :  { %672 = vmatprep.mubr.msk.bf16.mxu1 %vm263_vm1, %v705_v10  ;;  %v523_v10 = vpop.permute.xlu0 %522 }
 0x103   :  { %673 = vmatmul.mubr.msk.bf16.gmra.mxu1 %vm263_vm1, %v706_v11  ;;  %v528_v11 = vpop.permute.xlu1 %527 }
 0x1bb   :  { %v670_v14 = vpop.f32.mrf.mxu1 }
 0x1bc   :  { %v323_v29 = vadd.f32 %v670_v14, %v223_v25 }
 0x1bd   :  { %v314_v15 = vpop.f32.mrf.mxu1 }
 0x1be   :  { %v315_v34 = vadd.f32 %v314_v15, %v213_v33 }
 0x1bf   :  { %v671_v17 = vpop.f32.mrf.mxu1 }
 0x1c0   :  { %v326_v24 = vadd.f32 %v671_v17, %v228_v22 }
 0x1c1   :  { %v317_v19 = vpop.f32.mrf.mxu1 }
 0x1c2   :  { %v318_v32 = vadd.f32 %v317_v19, %v218_v31  ;;  %v538_v19 = vpop.permute.xlu1 %537 }
 0x1c3   :  { %v674_v20 = vpop.f32.mrf.mxu1 }
 0x1c4   :  { %v339_v21 = vadd.f32 %v674_v20, %v243_v13 }
 0x1c5   :  { %v330_v23 = vpop.f32.mrf.mxu1 }
 0x1c6   :  { %725 = vtanh.f32 %v339_v21  ;;  %v331_v26 = vadd.f32 %v330_v23, %v233_v18  ;;  %v533_v18 = vpop.permute.xlu0 %532 }
 0x1c7   :  { %v675_v27 = vpop.f32.mrf.mxu1  ;;  %727 = vtanh.f32 %v326_v24 }
 0x1c8   :  { %729 = vtanh.f32 %v331_v26 }
 0x1c9   :  { %v333_v28 = vpop.f32.mrf.mxu1 }
 0x1ca   :  { %v334_v30 = vadd.f32 %v333_v28, %v238_v16  ;;  %v543_v31 = vpop.permute.xlu0 %542 }
 0x1cc   :  { %731 = vtanh.f32 %v334_v30 }
 0x1cd   :  { %733 = vtanh.f32 %v323_v29 }
 0x1ce   :  { %735 = vtanh.f32 %v318_v32  ;;  %v548_v32 = vpop.permute.xlu1 %547 }
 0x1cf   :  { %737 = vtanh.f32 %v315_v34 }
 0x1d3   :  { %v726_v35 = vpop.eup %725 }
 0x1d4   :  { %v361_v36 = vpack.c.bf16 %v726_v35, %v726_v35  ;;  %v728_v38 = vpop.eup %727 }
 0x1d5   :  { %v730_v39 = vpop.eup %729 }
 0x1d6   :  { %694 = vmatprep.subr.msk.bf16.mxu0 %vm276_vm2, %v361_v36  ;;  %v435_v37 = vsel %vm276_vm2, %v361_v36, 0 }
 0x1d7   :  { %677 = vmatpush3.bf16.msra.mxu0 %v435_v37 }
 0x1d9   :  { %v732_v40 = vpop.eup %731 }
 0x1da   :  { %v360_v41 = vpack.c.bf16 %v732_v40, %v730_v39  ;;  %v734_v42 = vpop.eup %733 }
 0x1db   :  { %v359_v43 = vpack.c.bf16 %v728_v38, %v734_v42  ;;  %v736_v44 = vpop.eup %735 }
 0x1dc   :  { %678 = vmatprep.subr.bf16.mxu0 %v360_v41  ;;  %v738_v45 = vpop.eup %737 }
 0x1dd   :  { %679 = vmatpush3.bf16.msra.mxu0 %v360_v41  ;;  %v358_v46 = vpack.c.bf16 %v736_v44, %v738_v45  ;;  %v584_v41 = vlaneseq }
 0x1de   :  { %680 = vmatprep.subr.bf16.mxu0 %v359_v43 }
 0x1df   :  { %v585_v44 = vshrl.u32 %v584_v41, 7 }
 0x1e1   :  { %681 = vmatpush3.bf16.msra.mxu0 %v359_v43 }
 0x1e2   :  { %682 = vmatprep.subr.bf16.mxu0 %v358_v46 }
 0x1e5   :  { %683 = vmatpush3.bf16.msra.mxu0 %v358_v46 }
 0x1e8   :  { %685 = vmatmul.mubr.msk.bf16.vlgmr.msra.gmra.mxu0 %vm263_vm1, %v708_v47  ;;  %v586_v47 = vsub.s32 0, %v585_v44 }
 0x1e9   :  { %688 = vmatprep.mubr.msk.bf16.mxu0 %vm263_vm1, %v709_v48 }
 0x1f0   :  { %689 = vmatmul.mubr.msk.bf16.gmra.mxu0 %vm263_vm1, %v710_v49  ;;  %v582_v49 = vpop.permute.xlu0 %581 }
 0x2a8   :  { %v686_v54 = vpop.f32.mrf.mxu0 }
 0x2a9   :  { %v480_v56 = vadd.f32 %v686_v54, %v382_v52 }
 0x2aa   :  { %v471_v55 = vpop.f32.mrf.mxu0 }
 0x2ab   :  { %v472_v57 = vadd.f32 %v471_v55, %v372_v50 }
 0x2ac   :  { %v687_v59 = vpop.f32.mrf.mxu0 }
 0x2ad   :  { %739 = vtanh.f32 %v472_v57  ;;  %v483_v60 = vadd.f32 %v687_v59, %v387_v53 }
 0x2ae   :  { %v474_v62 = vpop.f32.mrf.mxu0  ;;  %741 = vtanh.f32 %v480_v56 }
 0x2af   :  { %v475_v63 = vadd.f32 %v474_v62, %v377_v51  ;;  %743 = vtanh.f32 %v483_v60  ;;  %v587_v51 = vrot.slane %v582_v49, %v586_v47 }
 0x2b0   :  { %v690_v0 = vpop.f32.mrf.mxu0 }
 0x2b1   :  { %745 = vtanh.f32 %v475_v63  ;;  %v496_v3 = vadd.f32 %v690_v0, %v402_v1 }
 0x2b2   :  { %v487_v2 = vpop.f32.mrf.mxu0 }
 0x2b3   :  { %v488_v4 = vadd.f32 %v487_v2, %v392_v58 }
 0x2b4   :  { %v691_v6 = vpop.f32.mrf.mxu0 }
 0x2b5   :  { %747 = vtanh.f32 %v488_v4 }
 0x2b6   :  { %v490_v7 = vpop.f32.mrf.mxu0  ;;  %749 = vtanh.f32 %v496_v3 }
 0x2b7   :  { %v491_v8 = vadd.f32 %v490_v7, %v397_v61 }
 0x2b9   :  { %751 = vtanh.f32 %v491_v8 }
 0x2ba   :  { %v740_v9 = vpop.eup %739 }
 0x2bb   :  { %v742_v12 = vpop.eup %741  ;;  %v550_v14 = vmul.f32 %v740_v9, %v518_v5 }
 0x2bc   :  { %v744_v13 = vpop.eup %743  ;;  %v552_v16 = vmul.f32 %v742_v12, %v528_v11 }
 0x2bd   :  { %v558_v20 = vsel %vm557_vm3, %v550_v14, 0.0  ;;  %v553_v21 = vmul.f32 %v744_v13, %v533_v18 }
 0x2be   :  { %v746_v15 = vpop.eup %745  ;;  %v561_v25 = vsel %vm557_vm3, %v552_v16, 0.0 }
 0x2bf   :  { %v551_v17 = vmul.f32 %v746_v15, %v523_v10  ;;  %v563_v29 = vsel %vm557_vm3, %v553_v21, 0.0 }
 0x2c1   :  { %v559_v22 = vsel %vm557_vm3, %v551_v17, 0.0 }
 0x2c2   :  { %v748_v23 = vpop.eup %747  ;;  %v560_v24 = vadd.f32 %v559_v22, %v558_v20 }
 0x2c3   :  { %v554_v26 = vmul.f32 %v748_v23, %v538_v19  ;;  %v750_v27 = vpop.eup %749 }
 0x2c4   :  { %v562_v28 = vadd.f32 %v561_v25, %v560_v24  ;;  %v556_v35 = vmul.f32 %v750_v27, %v548_v32 }
 0x2c5   :  { %v565_v36 = vsel %vm557_vm3, %v554_v26, 0.0 }
 0x2c6   :  { %v752_v30 = vpop.eup %751  ;;  %v564_v33 = vadd.f32 %v563_v29, %v562_v28  ;;  %v570_v40 = vsel %vm569_vm4, %v556_v35, 0.0 }
 0x2c7   :  { %v555_v34 = vmul.f32 %v752_v30, %v543_v31 }
 0x2c8   :  { %v566_v37 = vadd.f32 %v565_v36, %v564_v33 }
 0x2c9   :  { %v567_v38 = vsel %vm557_vm3, %v555_v34, 0.0 }
 0x2ca   :  { %v568_v39 = vadd.f32 %v567_v38, %v566_v37 }
 0x2cc   :  { %v571_v42 = vadd.f32 %v570_v40, %v568_v39 }
 0x2ce   :  { %v572_v43 = vrot.slane %v571_v42, 4 }
 0x2d0   :  { %v573_v45 = vadd.f32 %v572_v43, %v571_v42 }
 0x2d2   :  { %v574_v46 = vrot.slane %v573_v45, 2 }
 0x2d4   :  { %v575_v48 = vadd.f32 %v574_v46, %v573_v45 }
 0x2d6   :  { %v576_v50 = vrot.slane %v575_v48, 1 }
 0x2d8   :  { %v577_v52 = vadd.f32 %v576_v50, %v575_v48 }
 0x2da   :  { %v588_v53 = vadd.f32 %v587_v51, %v577_v52 }
 0x2dc   :  { %590 = vst.msk [vmem:[#allocation3] sm:$0x1] %vm589_vm5, %v588_v53 }
 0x2dd   :  { %764 = shalt.err (!%p761_p4)
}
 0x2de   :  { %600 = dma.vmem_to_hbm [thread:$0]  %s598_s8, 16, %s989_s9, [#allocation4]  }
 0x2df   :  { %773 = dma.done.wait [#allocation4], 16  }
 0x2e0   :  { %774 = vsyncadd [#allocation4], 4294967280 }
 0x2e1   :  { %604 = vsyncpa [#allocation4], 1 }

</bundles_post_ra>
